<compile_context>
chip_gen: v7x
topology: tpu7x:2x2x1
jax: 0.10.0
libtpu: 0.0.40
codegen_flags: <defaults>
</compile_context>

<pallas_src>
import functools

import jax
import jax.numpy as jnp
from jax.experimental import pallas as pl
from jax.experimental.pallas import tpu as pltpu


def _layer_norm_2d_kernel(x_ref, w_ref, b_ref, o_ref, *, eps: float, inv_c: float):
    # x_ref / o_ref: (C, T) blocks (leading batch dim squeezed); w_ref/b_ref: (C, 1)
    x = x_ref[...].astype(jnp.float32)                        # (C, T)
    # One-pass statistics over channels: E[x], E[x^2]
    s1 = jnp.sum(x, axis=0, keepdims=True)                    # (1, T)
    s2 = jnp.sum(x * x, axis=0, keepdims=True)                # (1, T)
    mean = s1 * inv_c
    var = jnp.maximum(s2 * inv_c - mean * mean, 0.0)          # biased variance
    inv = jax.lax.rsqrt(var + eps)                            # (1, T)
    w = w_ref[...].astype(jnp.float32)                        # (C, 1)
    b = b_ref[...].astype(jnp.float32)                        # (C, 1)
    scale = w * inv                                           # (C, T), fuses w into inv
    o_ref[...] = ((x - mean) * scale + b).astype(o_ref.dtype)


def _round_up(v: int, m: int) -> int:
    return ((v + m - 1) // m) * m


def _pick_tile_hw(hw: int, C: int, itemsize: int, B: int,
                  vmem_budget_bytes: int = 16 * 1024 * 1024,
                  max_tile: int = 4096) -> int:
    """Pick a lane-dense spatial tile (multiple of 128) sized for VMEM.

    Budget covers the 4 pipelined buffers (2x input + 2x output) of (C, tile)
    at `itemsize` bytes; kept <= ~16 MiB so it fits every generation's scoped
    VMEM (v5e 16 MiB default, v7x 64 MiB physical) with headroom.
    """
    hw128 = _round_up(hw, 128)
    cap = vmem_budget_bytes // (4 * max(C, 1) * itemsize)
    cap = max(128, (cap // 128) * 128)
    tile = min(cap, max_tile, hw128)

    # Prefer a tile that divides the (128-rounded) spatial extent: all blocks
    # full, no extra padding, no masked partial stores.
    if hw128 % tile != 0:
        t = tile
        best = 128
        while t >= 128:
            if hw128 % t == 0:
                best = t
                break
            t -= 128
        if best >= min(1024, tile):
            tile = best

    # v7x megacore: make sure there are >= 2 parallel grid steps even when the
    # batch alone cannot provide them (2 TensorCores share one chip).
    if B < 2 and tile >= hw128 and hw128 >= 256:
        tile = max(128, ((hw128 // 2) // 128) * 128)

    return tile


def layer_norm_2d(x: jax.Array, weight: jax.Array, bias: jax.Array,
                  eps: float = 1e-6) -> jax.Array:
    """LayerNorm2d forward.  x: (B, C, H, W); weight/bias: (C,)."""
    B, C, H, W = x.shape
    HW = H * W

    # NOTE: for very small C (< 8 sublanes, e.g. the demo C=4) vregs are only
    # partially filled; fine for correctness, and production C=256 fills them.
    tile_hw = _pick_tile_hw(HW, C, x.dtype.itemsize, B)
    hw_pad = _round_up(HW, tile_hw)

    x2 = x.reshape(B, C, HW)
    if hw_pad != HW:
        # Pad spatial up to a multiple of the (128-multiple) tile: lane-dense
        # blocks, no masked stores, no single giant fallback block.
        x2 = jnp.pad(x2, ((0, 0), (0, 0), (0, hw_pad - HW)))
    w2 = weight.reshape(C, 1)
    b2 = bias.reshape(C, 1)

    out = pl.pallas_call(
        functools.partial(_layer_norm_2d_kernel, eps=eps, inv_c=1.0 / C),
        out_shape=jax.ShapeDtypeStruct((B, C, hw_pad), x.dtype),
        grid_spec=pltpu.PrefetchScalarGridSpec(
            num_scalar_prefetch=0,
            grid=(B, hw_pad // tile_hw),
            in_specs=[
                # Leading batch dim squeezed -> kernel sees clean (C, T) refs.
                pl.BlockSpec((None, C, tile_hw), lambda b, i: (b, 0, i)),
                pl.BlockSpec((C, 1), lambda b, i: (0, 0)),
                pl.BlockSpec((C, 1), lambda b, i: (0, 0)),
            ],
            out_specs=pl.BlockSpec((None, C, tile_hw), lambda b, i: (b, 0, i)),
        ),
        compiler_params=pltpu.CompilerParams(
            dimension_semantics=("parallel", "parallel"),
            vmem_limit_bytes=32 * 1024 * 1024,
        ),
    )(x2, w2, b2)

    if hw_pad != HW:
        out = out[:, :, :HW]
    return out.reshape(B, C, H, W)


def layer_norm_2d_reference(x, weight, bias, eps=1e-6):
    x = x.astype(jnp.float32)
    u = jnp.mean(x, axis=1, keepdims=True)
    s = jnp.mean((x - u) ** 2, axis=1, keepdims=True)
    xn = (x - u) / jnp.sqrt(s + eps)
    return weight[None, :, None, None] * xn + bias[None, :, None, None]


if __name__ == "__main__":
    key = jax.random.PRNGKey(0)

    # Case 1: small shape consistent with the module (B=2, C=4, 16x16 spatial).
    B, C, H, W = 2, 4, 16, 16
    k1, k2 = jax.random.split(key)
    x = jax.random.normal(k1, (B, C, H, W), dtype=jnp.float32)
    # Deterministic parameter init, matching LayerNorm2d.__init__:
    weight = jnp.ones((C,), dtype=jnp.float32)
    bias = jnp.zeros((C,), dtype=jnp.float32)

    out = jax.block_until_ready(layer_norm_2d(x, weight, bias))
    ref = layer_norm_2d_reference(x, weight, bias)
    assert out.shape == (B, C, H, W)
    assert jnp.allclose(out, ref, atol=1e-4, rtol=1e-4), "mismatch vs reference (case 1)"

    # Case 2: B=1, non-128-multiple spatial -> exercises padding + megacore split.
    B2, C2, H2, W2 = 1, 8, 24, 24
    x2 = jax.random.normal(k2, (B2, C2, H2, W2), dtype=jnp.float32)
    w2 = jnp.ones((C2,), dtype=jnp.float32)
    b2 = jnp.zeros((C2,), dtype=jnp.float32)
    out2 = jax.block_until_ready(layer_norm_2d(x2, w2, b2))
    ref2 = layer_norm_2d_reference(x2, w2, b2)
    assert out2.shape == (B2, C2, H2, W2)
    assert jnp.allclose(out2, ref2, atol=1e-4, rtol=1e-4), "mismatch vs reference (case 2)"

    print("KERNEL_OK")
</pallas_src>

<mosaic_0001>
module attributes {stable_mosaic.version = 11 : i64} {
  func.func @_layer_norm_2d_kernel(%arg0: i32, %arg1: i32, %arg2: memref<1x4x256xf32, #tpu.memory_space<vmem>>, %arg3: memref<4x1xf32, #tpu.memory_space<vmem>>, %arg4: memref<4x1xf32, #tpu.memory_space<vmem>>, %arg5: memref<1x4x256xf32, #tpu.memory_space<vmem>>) attributes {dimension_semantics = [#tpu.dimension_semantics<parallel>, #tpu.dimension_semantics<parallel>], iteration_bounds = array<i64: 2, 1>, scalar_prefetch = 0 : i64, scratch_operands = 0 : i64, tpu.core_type = #tpu.core_type<tc>, window_params = [{transform_indices = @transform_0, window_bounds = array<i64: 1, 4, 256>}, {pipeline_mode = #tpu.pipeline_mode<synchronous>, transform_indices = @transform_1, window_bounds = array<i64: 4, 1>}, {pipeline_mode = #tpu.pipeline_mode<synchronous>, transform_indices = @transform_2, window_bounds = array<i64: 4, 1>}, {transform_indices = @transform_3, window_bounds = array<i64: 1, 4, 256>}]} {
    %c0 = arith.constant 0 : index
    %c0_0 = arith.constant 0 : index
    %c0_1 = arith.constant 0 : index
    %0 = vector.load %arg2[%c0, %c0_0, %c0_1] : memref<1x4x256xf32, #tpu.memory_space<vmem>>, vector<1x4x256xf32>
    %1 = vector.shape_cast %0 : vector<1x4x256xf32> to vector<4x256xf32>
    %cst = arith.constant dense<0.000000e+00> : vector<256xf32>
    %2 = vector.multi_reduction <add>, %1, %cst [0] : vector<4x256xf32> to vector<256xf32>
    %3 = vector.shape_cast %2 : vector<256xf32> to vector<1x256xf32>
    %4 = arith.mulf %1, %1 : vector<4x256xf32>
    %cst_2 = arith.constant dense<0.000000e+00> : vector<256xf32>
    %5 = vector.multi_reduction <add>, %4, %cst_2 [0] : vector<4x256xf32> to vector<256xf32>
    %6 = vector.shape_cast %5 : vector<256xf32> to vector<1x256xf32>
    %cst_3 = arith.constant 2.500000e-01 : f32
    %7 = vector.broadcast %cst_3 : f32 to vector<1x256xf32>
    %8 = arith.mulf %3, %7 : vector<1x256xf32>
    %cst_4 = arith.constant 2.500000e-01 : f32
    %9 = vector.broadcast %cst_4 : f32 to vector<1x256xf32>
    %10 = arith.mulf %6, %9 : vector<1x256xf32>
    %11 = arith.mulf %8, %8 : vector<1x256xf32>
    %12 = arith.subf %10, %11 : vector<1x256xf32>
    %cst_5 = arith.constant 0.000000e+00 : f32
    %13 = vector.broadcast %cst_5 : f32 to vector<1x256xf32>
    %14 = arith.maximumf %12, %13 : vector<1x256xf32>
    %cst_6 = arith.constant 9.99999997E-7 : f32
    %15 = vector.broadcast %cst_6 : f32 to vector<1x256xf32>
    %16 = arith.addf %14, %15 : vector<1x256xf32>
    %17 = math.rsqrt %16 : vector<1x256xf32>
    %c0_7 = arith.constant 0 : index
    %c0_8 = arith.constant 0 : index
    %18 = vector.load %arg3[%c0_7, %c0_8] : memref<4x1xf32, #tpu.memory_space<vmem>>, vector<4x1xf32>
    %c0_9 = arith.constant 0 : index
    %c0_10 = arith.constant 0 : index
    %19 = vector.load %arg4[%c0_9, %c0_10] : memref<4x1xf32, #tpu.memory_space<vmem>>, vector<4x1xf32>
    %20 = vector.broadcast %18 : vector<4x1xf32> to vector<4x256xf32>
    %21 = vector.broadcast %17 : vector<1x256xf32> to vector<4x256xf32>
    %22 = arith.mulf %20, %21 : vector<4x256xf32>
    %23 = vector.broadcast %8 : vector<1x256xf32> to vector<4x256xf32>
    %24 = arith.subf %1, %23 : vector<4x256xf32>
    %25 = arith.mulf %24, %22 : vector<4x256xf32>
    %26 = vector.broadcast %19 : vector<4x1xf32> to vector<4x256xf32>
    %27 = arith.addf %25, %26 : vector<4x256xf32>
    %c0_11 = arith.constant 0 : index
    %c0_12 = arith.constant 0 : index
    %c0_13 = arith.constant 0 : index
    %28 = vector.load %arg5[%c0_11, %c0_12, %c0_13] : memref<1x4x256xf32, #tpu.memory_space<vmem>>, vector<1x4x256xf32>
    %29 = vector.shape_cast %28 : vector<1x4x256xf32> to vector<4x256xf32>
    %30 = vector.shape_cast %27 : vector<4x256xf32> to vector<1x4x256xf32>
    tpu.vector_store %arg5[%c0_11, %c0_12, %c0_13], %30 {strides = array<i32>} : memref<1x4x256xf32, #tpu.memory_space<vmem>>, vector<1x4x256xf32>,
    return
  }
  func.func @transform_0(%arg0: i32, %arg1: i32) -> (i32, i32, i32) {
    %c0_i32 = arith.constant 0 : i32
    %c0_i32_0 = arith.constant 0 : i32
    return %arg0, %c0_i32, %arg1 : i32, i32, i32
  }
  func.func @transform_1(%arg0: i32, %arg1: i32) -> (i32, i32) {
    %c0_i32 = arith.constant 0 : i32
    %c0_i32_0 = arith.constant 0 : i32
    %c0_i32_1 = arith.constant 0 : i32
    return %c0_i32, %c0_i32_0 : i32, i32
  }
  func.func @transform_2(%arg0: i32, %arg1: i32) -> (i32, i32) {
    %c0_i32 = arith.constant 0 : i32
    %c0_i32_0 = arith.constant 0 : i32
    %c0_i32_1 = arith.constant 0 : i32
    return %c0_i32, %c0_i32_0 : i32, i32
  }
  func.func @transform_3(%arg0: i32, %arg1: i32) -> (i32, i32, i32) {
    %c0_i32 = arith.constant 0 : i32
    %c0_i32_0 = arith.constant 0 : i32
    return %arg0, %c0_i32, %arg1 : i32, i32, i32
  }
}

</mosaic_0001>

<bundles_post_ra>
// kernel: tpu_custom_call.1
= control target key start
LH: loop header
LB: loop body
LE: loop exit
PB: predicated region body
PF: predicated region fallthrough
CT: control target
= control target key end

     0   :  { %8 = vsyncpa [#allocation3], 0  ;;  %s799_s0 = inlined_call_operand.hbm [shape: f32[2,4,256], index: 0, kind: input, shape index: {}]   ;;  %s800_s1 = inlined_call_operand.vmem [shape: f32[4,1], index: 1, kind: input, shape index: {}]   ;;  %s801_s2 = inlined_call_operand.vmem [shape: f32[4,1], index: 2, kind: input, shape index: {}]   ;;  %s802_s3 = inlined_call_operand.hbm [shape: f32[2,4,256], index: 3, kind: output, shape index: {}]  }
   0x1   :  { %10 = vsyncpa [#allocation3 + $0x1], 0 }
   0x2   :  { %11 = vsyncpa [#allocation4], 0 }
   0x3   :  { %13 = vsyncpa [#allocation4 + $0x1], 0  ;;  %s617_s12 = smov 0   ;;  %s619_s13 = smov 0  }
   0x4   :  { %s621_s14 = smov 0   ;;  %s623_s15 = smov 0  }
   0x5   :  { %s625_s16 = smov 0   ;;  %s627_s17 = smov 0  }
   0x6 LB: > { %s392_s18 = sadd.s32 4294967295, %s591_s17   ;;  %s393_s19 = sadd.s32 4294967294, %s591_s17   ;;  %s591_s17 = sphi %s627_s17, %s19_s17   ;;  %s587_s16 = sphi %s625_s16, %s818_s16   ;;  %s583_s15 = sphi %s623_s15, %s817_s15   ;;  %s579_s14 = sphi %s621_s14, %s816_s14   ;;  %s575_s13 = sphi %s619_s13, %s815_s13   ;;  %s571_s12 = sphi %s617_s12, %s814_s12  }
   0x7   : > { %s31_s20 = sadd.s32 1, %s587_s16  ;;  %s40_s21 = sadd.s32 1, %s579_s14 }
   0x8   : > { %p33_p0 = scmp.ge.s32.totalorder %s31_s20, 2  ;;  %p47_p1 = scmp.ne.s32.totalorder %s579_s14, %s575_s13 }
   0x9   : > { %p48_p2 = scmp.eq.s32.totalorder %s591_s17, 0  ;;  %p53_p3 = scmp.ne.s32.totalorder %s575_s13, %s571_s12 }
   0xa   : > { %s820_s20 = smov (%p33_p0, %s31_s20), 0  ;;  %p54_p5 = scmp.eq.s32.totalorder %s392_s18, 0 }
   0xb   : > { %p658_p4 = por %p48_p2, %p47_p1  ;;  %s35_s23 = ssub.s32 %s587_s16, %s820_s20 }
   0xc   : > { %p121_p6 = scmp.eq.s32.totalorder %s392_s18, 1  ;;  %p38_p7 = scmp.eq.s32.totalorder %s35_s23, 0 }
   0xd   : > { %p664_p8 = por %p54_p5, %p53_p3  ;;  %p127_p10 = scmp.eq.s32.totalorder %s393_s19, 1 }
   0xe   : > { %p668_p9 = por %p121_p6, %p47_p1  ;;  %p421_p13 = scmp.lt.s32.totalorder %s591_s17, 2 }
   0xf   : > { %s673_s26 = scalar_select %p38_p7, %s579_s14, %s40_s21  }
  0x10   : > { %s806_s25 = scalar_select %p668_p9, 1, 0 }
  0x11   : > { %p675_p11 = por %p127_p10, %p53_p3  ;;  %s153_s28 = sand.u32 1, %s579_s14  }
  0x12   : > { %s396_s29 = sshll.u32 %s153_s28, 3  ;;  %s407_s30 = sshll.u32 %s587_s16, 7 }
  0x13   : > { %s807_s27 = scalar_select %p675_p11, 1, 0 }
  0x14   : > { %s686_s6 = scalar_lea.hbm %s799_s0, %s407_s30  ;;  %s157_s7 = scalar_lea.vmem [#allocation2], %s396_s29 }
  0x15   : > { %s167_s8 = sshll.u32 %s157_s7, 4  ;;  %p692_p0 = pnand %p421_p13, %p658_p4  ;;  %s688_s8 = int_to_ptr.vmem [resolvable:$true] %s167_s8 }
  0x16   : > { %s154_s10 = scalar_lea.sflag [#allocation3], %s153_s28  ;;  %s479_s11 = scalar_lea.hbm %s686_s6, 128 }
  0x17   : > { %p480_p3 = scmp.ne.s32.totalorder %s686_s6, %s479_s11  ;;  %p481_p5 = pneg %p692_p0 }
  0x18   : > { %s484_s21 = scalar_lea.hbm %s799_s0, 256  ;;  %p485_p4 = scmp.lt.u32.totalorder %s686_s6, %s799_s0 }
  0x19   : > { %p482_p6 = pnand %p481_p5, %p480_p3  ;;  %p486_p10 = scmp.lt.u32.totalorder %s484_s21, %s479_s11 }
  0x1a   : > { %p488_p12 = scmp.lt.u32.totalorder %s479_s11, %s686_s6 }
  0x1b   : > { %p483_p7 = pneg %p482_p6  ;;  %p487_p13 = por %p486_p10, %p485_p4 }
  0x1d   : > { %p489_p1 = por %p488_p12, %p487_p13 }
  0x1f   : > { %p490_p2 = pnand %p489_p1, %p483_p7 }
  0x21   : > { %493 = shalt.err (!%p490_p2)
}
  0x22   : > { %s494_s28 = scalar_lea.vmem %s688_s8, 128  ;;  %s593_s29 = smov [#allocation2]  }
  0x23   : > { %p495_p3 = scmp.ne.s32.totalorder %s688_s8, %s494_s28  ;;  %s499_s30 = sshll.u32 %s593_s29, 4  ;;  %s500_s30 = int_to_ptr.vmem [resolvable:$false] %s499_s30 }
  0x24   : > { %s501_s4 = scalar_lea.vmem %s500_s30, 256  ;;  %p502_p9 = scmp.lt.s32.totalorder %s688_s8, %s500_s30 }
  0x25   : > { %p497_p6 = pnand %p495_p3, %p481_p5  ;;  %p503_p4 = scmp.lt.s32.totalorder %s501_s4, %s494_s28 }
  0x27   : > { %p498_p11 = pneg %p497_p6  ;;  %p504_p10 = por %p503_p4, %p502_p9 }
  0x29   : > { %p505_p12 = pnand %p504_p10, %p498_p11 }
  0x2b   : > { %508 = shalt.err (!%p505_p12)
}
  0x2c   : > { %416 = dma.hbm_to_vmem [thread:$0]  (!%p692_p0), %s686_s6, 128, %s688_s8, %s154_s10  }
  0x2d   : > { %p809_p1 = scmp.lt.s32.totalorder %s591_s17, 3  ;;  %p810_p2 = scmp.ge.s32.totalorder %s591_s17, 1 }
  0x2f   : > { %p173_p5 = pnand %p810_p2, %p809_p1 }
  0x30   : > { %s728_s5 = sand.u32 (!%p173_p5), 1, %s575_s13  }
  0x31   : > { %176 = sbr.rel (%p173_p5) target bundleno = 209 (0xd1), region = 32  ;;  %s400_s7 = sshll.u32 (!%p173_p5), %s728_s5, 3 }
  0x32   : > { %s179_s11 = scalar_lea.sflag (!%p173_p5), [#allocation3], %s728_s5  ;;  %s182_s9 = scalar_lea.vmem (!%p173_p5), [#allocation2], %s400_s7 }
  0x38   : > { %562 = dma.done.wait (%p664_p8), %s179_s11, 128  }
  0x39   : > { %564 = vsyncadd (%p664_p8), %s179_s11, 4294967168  ;;  %v594_v0 = vmov 0   ;;  %v258_v1 = vld [vmem:[%s800_s1] sm:$0xf]  ;;  %vm211_vm0 = vcmask 1043456   ;;  %v284_v49 = vlaneseq  ;;  %s408_s24 = sshll.u32 %s583_s15, 7 }
  0x3a   : > { %473 = vset.pattern.permute.xlu0 %v594_v0  ;;  %v259_v2 = vld [vmem:[%s801_s2] sm:$0xf]  ;;  %v595_v47 = vmov 839922192   ;;  %s204_s19 = scalar_lea.vmem [#allocation5], %s400_s7  ;;  %s750_s28 = scalar_lea.hbm %s802_s3, %s408_s24 }
  0x3b   : > { %262 = vperm.xlu0 %473, %v258_v1   ;;  %v207_v3 = vld [vmem:[%s182_s9] sm:$0xff]  ;;  %v282_v48 = vunpack.c.l.s4 %v595_v47  ;;  %v285_v52 = vshrl.u32 %v284_v49, 7  ;;  %s308_s21 = sshll.u32 %s204_s19, 4  ;;  %s292_s29 = scalar_lea.sflag [#allocation4], %s728_s5  ;;  %s752_s21 = int_to_ptr.vmem [resolvable:$true] %s308_s21 }
  0x3c   : > { %v209_v4 = vcombine.high %v207_v3, %v207_v3  ;;  %v226_v5 = vmul.f32 %v207_v3, %v207_v3  ;;  %v212_v6 = vsel %vm211_vm0, %v207_v3, 0.0  ;;  %s509_s30 = scalar_lea.vmem %s752_s21, 128  ;;  %p811_p9 = scmp.ne.s32.totalorder %s806_s25, 0 }
  0x3d   : > { %v213_v9 = vrot.slane %v212_v6, 4  ;;  %v283_v51 = vunpack.c.0.s8 %v282_v48  ;;  %p510_p8 = scmp.ne.s32.totalorder %s752_s21, %s509_s30  ;;  %s596_s15 = smov [#allocation5]  }
  0x3e   : > { %v219_v7 = vsel %vm211_vm0, %v209_v4, 0.0  ;;  %v228_v8 = vcombine.high %v226_v5, %v226_v5  ;;  %v230_v11 = vsel %vm211_vm0, %v226_v5, 0.0  ;;  %s513_s4 = sshll.u32 %s596_s15, 4  ;;  %s514_s4 = int_to_ptr.vmem [resolvable:$false] %s513_s4 }
  0x3f   : > { %279 = vperm.xlu0 %473, %v259_v2   ;;  %v220_v10 = vrot.slane %v219_v7, 4  ;;  %v214_v13 = vadd.f32 %v213_v9, %v212_v6  ;;  %v231_v14 = vrot.slane %v230_v11, 4  ;;  %v286_v58 = vsub.s32 %v283_v51, %v285_v52  ;;  %p511_p11 = pnand %p510_p8, %p811_p9  ;;  %s515_s7 = scalar_lea.vmem %s514_s4, 256 }
  0x40   : > { %v237_v12 = vsel %vm211_vm0, %v228_v8, 0.0  ;;  %p516_p7 = scmp.lt.s32.totalorder %s752_s21, %s514_s4  ;;  %p517_p13 = scmp.lt.s32.totalorder %s515_s7, %s509_s30 }
  0x41   : > { %v221_v15 = vadd.f32 %v220_v10, %v219_v7  ;;  %v238_v16 = vrot.slane %v237_v12, 4  ;;  %v215_v17 = vrot.slane %v214_v13, 2  ;;  %v232_v18 = vadd.f32 %v231_v14, %v230_v11  ;;  %p512_p0 = pneg %p511_p11 }
  0x42   : > { %p518_p3 = por %p517_p13, %p516_p7 }
  0x43   : > { %v222_v19 = vrot.slane %v221_v15, 2  ;;  %v239_v20 = vadd.f32 %v238_v16, %v237_v12  ;;  %v216_v21 = vadd.f32 %v215_v17, %v214_v13  ;;  %v233_v22 = vrot.slane %v232_v18, 2 }
  0x44   : > { %p519_p6 = pnand %p518_p3, %p512_p0 }
  0x45   : > { %v223_v23 = vadd.f32 %v222_v19, %v221_v15  ;;  %v240_v24 = vrot.slane %v239_v20, 2  ;;  %v217_v25 = vrot.slane %v216_v21, 1  ;;  %v234_v26 = vadd.f32 %v233_v22, %v232_v18 }
  0x47   : > { %v224_v27 = vrot.slane %v223_v23, 1  ;;  %v241_v28 = vadd.f32 %v240_v24, %v239_v20  ;;  %v218_v29 = vadd.f32 %v217_v25, %v216_v21  ;;  %v235_v30 = vrot.slane %v234_v26, 1 }
  0x49   : > { %v225_v31 = vadd.f32 %v224_v27, %v223_v23  ;;  %v242_v32 = vrot.slane %v241_v28, 1  ;;  %v236_v33 = vadd.f32 %v235_v30, %v234_v26  ;;  %v244_v34 = vmul.f32 0.25, %v218_v29 }
  0x4b   : > { %v243_v35 = vadd.f32 %v242_v32, %v241_v28  ;;  %v245_v36 = vmul.f32 0.25, %v225_v31  ;;  %v246_v37 = vmul.f32 0.25, %v236_v33  ;;  %v248_v38 = vmul.f32 %v244_v34, %v244_v34 }
  0x4d   : > { %v247_v39 = vmul.f32 0.25, %v243_v35  ;;  %v249_v40 = vmul.f32 %v245_v36, %v245_v36  ;;  %v250_v41 = vsub.f32 %v246_v37, %v248_v38  ;;  %v269_v53 = vcombine.low %v244_v34, %v245_v36 }
  0x4f   : > { %v251_v42 = vsub.f32 %v247_v39, %v249_v40  ;;  %v252_v43 = vmax.f32 %v250_v41, 0.0  ;;  %v271_v59 = vsub.f32 %v207_v3, %v269_v53 }
  0x51   : > { %v253_v44 = vmax.f32 %v251_v42, 0.0  ;;  %v254_v45 = vadd.f32 1e-06, %v252_v43 }
  0x53   : > { %v255_v46 = vadd.f32 1e-06, %v253_v44  ;;  %475 = vrsqrt.f32 %v254_v45 }
  0x55   : > { %477 = vrsqrt.f32 %v255_v46 }
  0x5d   : > { %v476_v50 = vpop.eup %475 }
  0x5f   : > { %v478_v54 = vpop.eup %477 }
  0xba   : > { %v263_v55 = vpop.permute.xlu0 %262 }
  0xbb   : > { %v265_v56 = vmul.f32 %v476_v50, %v263_v55  ;;  %v266_v57 = vmul.f32 %v478_v54, %v263_v55 }
  0xbd   : > { %v274_v60 = vcombine.low %v265_v56, %v266_v57 }
  0xbe   : > { %v280_v61 = vpop.permute.xlu0 %279 }
  0xbf   : > { %v276_v62 = vmul.f32 %v274_v60, %v271_v59  ;;  %v287_v63 = vrot.slane %v280_v61, %v286_v58 }
  0xc1   : > { %v289_v0 = vadd.f32 %v287_v63, %v276_v62 }
  0xc3   : > { %290 = vst [vmem:[%s204_s19] sm:$0xff] %v289_v0 }
  0xc4   : > { %522 = shalt.err (!%p519_p6)
}
  0xc5   : > { %s523_s5 = scalar_lea.hbm %s750_s28, 128  ;;  %s527_s6 = scalar_lea.hbm %s802_s3, 256 }
  0xc6   : > { %p524_p4 = scmp.ne.s32.totalorder %s750_s28, %s523_s5  ;;  %p528_p1 = scmp.lt.u32.totalorder %s750_s28, %s802_s3 }
  0xc7   : > { %p529_p2 = scmp.lt.u32.totalorder %s527_s6, %s523_s5  ;;  %p531_p8 = scmp.lt.u32.totalorder %s523_s5, %s750_s28 }
  0xc8   : > { %p525_p10 = pnand %p524_p4, %p811_p9 }
  0xc9   : > { %p530_p5 = por %p529_p2, %p528_p1 }
  0xca   : > { %p526_p12 = pneg %p525_p10 }
  0xcb   : > { %p532_p11 = por %p531_p8, %p530_p5 }
  0xcd   : > { %p533_p0 = pnand %p532_p11, %p526_p12 }
  0xcf   : > { %536 = shalt.err (!%p533_p0)
}
  0xd0   : > { %411 = dma.vmem_to_hbm [thread:$0]  (%p811_p9), %s752_s21, 128, %s750_s28, %s292_s29  }
  0xd1 PF: > { %s320_s18 = sand.u32 1, %s571_s12   ;;  %p812_p7 = scmp.ne.s32.totalorder %s807_s27, 0 }
  0xd2   : > { %p813_p13 = scmp.ge.s32.totalorder %s591_s17, 2  ;;  %s321_s24 = scalar_lea.sflag [#allocation4], %s320_s18 }
  0xd4   : > { %p418_p3 = pnand %p813_p13, %p812_p7 }
  0xd6   : > { %566 = dma.done.wait (!%p418_p3), %s321_s24, 128  }
  0xd7   : > { %568 = vsyncadd (!%p418_p3), %s321_s24, 4294967168  ;;  %s19_s17 = sadd.s32 1, %s591_s17   ;;  %s814_s12 = smov %s575_s13 }
  0xd8   : > { %p16_p6 = scmp.ge.s32.totalorder %s19_s17, 4   ;;  %s815_s13 = smov %s579_s14 }
  0xd9   : > { %s816_s14 = smov %s673_s26  ;;  %s817_s15 = smov %s587_s16 }
  0xda   : > { %s818_s16 = smov %s820_s20  ;;  %18 = sbr.rel (!%p16_p6) target bundleno = 6 (0x6), region = 77 }
  0xe1   :  { %326 = vsyncpa [#allocation3], 1 }
  0xe2   :  { %328 = vsyncpa [#allocation3 + $0x1], 1 }
  0xe3   :  { %329 = vsyncpa [#allocation4], 1 }
  0xe4   :  { %331 = vsyncpa [#allocation4 + $0x1], 1 }

</bundles_post_ra>
